<compile_context>
chip_gen: v5e
topology: v5e:2x2
jax: 0.10.0
libtpu: 0.0.40
codegen_flags: <defaults>
</compile_context>

<pallas_src>
import functools
import math

import jax
import jax.numpy as jnp
from jax.experimental import pallas as pl
from jax.experimental.pallas import tpu as pltpu


# ---------------------------------------------------------------------------
# Geometric features (glue, tiny: [B, 4, 2] -> [B, 10])
# ---------------------------------------------------------------------------
def _geometric_features(keypoints):
    kp = keypoints.astype(jnp.float32)                       # [B, 4, 2]
    nxt = jnp.roll(kp, shift=-1, axis=1)                     # keypoints[(i+1)%4]
    prv = jnp.roll(kp, shift=1, axis=1)                      # keypoints[(i-1)%4]

    # edge lengths: dist(kp[i+1], kp[i])
    edge = jnp.sqrt(jnp.sum((nxt - kp) ** 2, axis=2))        # [B, 4]

    # diagonal lengths
    diag1 = jnp.sqrt(jnp.sum((kp[:, 0, :] - kp[:, 2, :]) ** 2, axis=1))
    diag2 = jnp.sqrt(jnp.sum((kp[:, 1, :] - kp[:, 3, :]) ** 2, axis=1))
    diags = jnp.stack([diag1, diag2], axis=1)                # [B, 2]

    # internal angles (degrees)
    v_prev = prv - kp
    v_next = nxt - kp
    n_prev = jnp.sqrt(jnp.sum(v_prev ** 2, axis=2, keepdims=True))
    n_next = jnp.sqrt(jnp.sum(v_next ** 2, axis=2, keepdims=True))
    vp = v_prev / (n_prev + 1e-6)
    vn = v_next / (n_next + 1e-6)
    cos_a = jnp.clip(jnp.sum(vp * vn, axis=2), -1.0, 1.0)
    angles = jnp.arccos(cos_a) * 180.0 / math.pi              # [B, 4]

    perimeter = jnp.sum(edge, axis=1, keepdims=True)
    edge_norm = edge / (perimeter + 1e-6)
    diag_sum = jnp.sum(diags, axis=1, keepdims=True)
    diag_norm = diags / (diag_sum + 1e-6)

    return jnp.concatenate([edge_norm, diag_norm, angles / 180.0], axis=1)  # [B, 10]


# ---------------------------------------------------------------------------
# Pallas kernel: batched constraint-encoder MLP + folded fusion Linear.
#   geo_ref : (TB, 10) f32     kpf_ref : (TB, K*F) native dtype
#   w1(10,H2) w2(H2,H) w3f(H,K*F) wkbd(K*F,K*F)   -- compute_dtype (bf16 default)
#   b1(1,H2)  b2(1,H)  b3f(1,K*F)                 -- f32
# MXU operands in compute_dtype, accumulation / bias / ReLU in f32.
# ---------------------------------------------------------------------------
def _quad_constraint_kernel(geo_ref, kpf_ref,
                            w1_ref, b1_ref, w2_ref, b2_ref,
                            w3f_ref, b3f_ref, wkbd_ref, out_ref,
                            *, compute_dtype):
    cd = compute_dtype

    # constraint encoder: Linear -> ReLU -> Linear -> ReLU
    h = jnp.dot(geo_ref[...].astype(cd), w1_ref[...],
                preferred_element_type=jnp.float32) + b1_ref[...]
    h = jnp.maximum(h, 0.0)
    h = jnp.dot(h.astype(cd), w2_ref[...],
                preferred_element_type=jnp.float32) + b2_ref[...]
    h = jnp.maximum(h, 0.0)

    # folded (layer-3 @ fusion-constraint-half), already tiled K times on lanes
    cfc = jnp.dot(h.astype(cd), w3f_ref[...],
                  preferred_element_type=jnp.float32) + b3f_ref[...]        # (TB, K*F)

    # keypoint-feature path through block-diagonal fusion weight (lane-dense)
    out = jnp.dot(kpf_ref[...].astype(cd), wkbd_ref[...],
                  preferred_element_type=jnp.float32) + cfc                  # (TB, K*F)
    out_ref[...] = out.astype(out_ref.dtype)


def _full_spec(shape):
    n = len(shape)
    return pl.BlockSpec(shape, lambda b, _n=n: (0,) * _n)


def _round_up(x, m):
    return (x + m - 1) // m * m


def quad_constraint_forward(params, keypoint_features, keypoints, *,
                            tb_target=2048, compute_dtype=jnp.bfloat16):
    B, K, F = keypoint_features.shape
    KF = K * F
    out_dtype = keypoint_features.dtype

    geo = _geometric_features(keypoints)                       # [B, 10] f32
    kpf_flat = keypoint_features.reshape(B, KF)                # lane-dense, native dtype

    # --- fold fusion Linear into the encoder at trace time (in f32) ---------
    w1 = params["w1"]
    w2 = params["w2"]
    w3, b3 = params["w3"], params["b3"]
    wf, bf = params["wf"], params["bf"]
    H2 = w1.shape[1]
    H = w2.shape[1]

    wf_k = wf[:F]                                              # (F, F)  keypoint half
    wf_c = wf[F:]                                              # (F, F)  constraint half
    w3f = jnp.tile(w3 @ wf_c, (1, K))                          # (H, K*F)
    b3f = jnp.tile(b3 @ wf_c + bf, (1, K))                     # (1, K*F)
    wk_bd = jnp.kron(jnp.eye(K, dtype=wf.dtype), wf_k)         # (K*F, K*F) block-diag
    # TODO(synk): for F >= 128 replace the kron block-diagonal matmul with a
    # dense (B*K, F) @ (F, F) matmul (kron wastes K-fold MXU work / weight bytes).

    # MXU operands in compute_dtype, biases stay f32 (f32 accumulation in kernel).
    w1c = w1.astype(compute_dtype)
    w2c = w2.astype(compute_dtype)
    w3fc = w3f.astype(compute_dtype)
    wkbdc = wk_bd.astype(compute_dtype)
    b1 = params["b1"].astype(jnp.float32)
    b2 = params["b2"].astype(jnp.float32)
    b3f = b3f.astype(jnp.float32)

    # --- batch tiling --------------------------------------------------------
    # Tiny B: single full block (block dims equal array dims -> always legal).
    # Otherwise: aim for >= 2 grid steps (engages both v7x TCs) but cap the
    # tile at tb_target rows; tiles are multiples of 8 (sublane granularity).
    if B <= 8:
        TB, Bp = B, B
    else:
        TB = min(tb_target, _round_up(pl.cdiv(B, 2), 8))
        Bp = _round_up(B, TB)
    if Bp != B:
        pad = Bp - B
        geo = jnp.pad(geo, ((0, pad), (0, 0)))
        kpf_flat = jnp.pad(kpf_flat, ((0, pad), (0, 0)))
    grid = (Bp // TB,)

    # --- VMEM budget (explicit so v5e's 16 MiB default doesn't reject tiles) -
    bpe_kpf = jnp.dtype(kpf_flat.dtype).itemsize
    bpe_out = jnp.dtype(out_dtype).itemsize
    weights = (w1c, b1, w2c, b2, w3fc, b3f, wkbdc)
    weight_bytes = sum(int(a.size) * jnp.dtype(a.dtype).itemsize for a in weights)
    tile_bytes = TB * (128 * 4 + KF * bpe_kpf + KF * bpe_out)  # geo lane-padded to 128
    vmem_limit = int(max(2 * tile_bytes + 2 * weight_bytes + (4 << 20), 32 << 20))

    flops_per_row = 2 * (10 * H2 + H2 * H + H * KF + KF * KF)
    cost = pl.CostEstimate(
        flops=Bp * flops_per_row,
        transcendentals=0,
        bytes_accessed=Bp * (10 * 4 + KF * bpe_kpf + KF * bpe_out) + weight_bytes,
    )

    kernel = functools.partial(_quad_constraint_kernel, compute_dtype=compute_dtype)

    out_flat = pl.pallas_call(
        kernel,
        out_shape=jax.ShapeDtypeStruct((Bp, KF), out_dtype),
        grid=grid,
        in_specs=[
            pl.BlockSpec((TB, 10), lambda b: (b, 0)),          # geometric features
            pl.BlockSpec((TB, KF), lambda b: (b, 0)),          # keypoint features (lane-dense)
            _full_spec(w1c.shape), _full_spec(b1.shape),
            _full_spec(w2c.shape), _full_spec(b2.shape),
            _full_spec(w3fc.shape), _full_spec(b3f.shape),
            _full_spec(wkbdc.shape),
        ],
        out_specs=pl.BlockSpec((TB, KF), lambda b: (b, 0)),
        compiler_params=pltpu.CompilerParams(
            dimension_semantics=("parallel",),
            vmem_limit_bytes=vmem_limit,
        ),
        cost_estimate=cost,
    )(geo, kpf_flat, w1c, b1, w2c, b2, w3fc, b3f, wkbdc)

    return out_flat[:B].reshape(B, K, F)


# ---------------------------------------------------------------------------
# Pure-JAX reference of the original (unfolded) module forward, for checking.
# ---------------------------------------------------------------------------
def _reference_forward(params, keypoint_features, keypoints):
    geo = _geometric_features(keypoints)
    h = jnp.maximum(geo @ params["w1"] + params["b1"], 0.0)
    h = jnp.maximum(h @ params["w2"] + params["b2"], 0.0)
    cf = h @ params["w3"] + params["b3"]                       # [B, F]
    B, K, F = keypoint_features.shape
    cf_exp = jnp.broadcast_to(cf[:, None, :], (B, K, F))
    combined = jnp.concatenate([keypoint_features.astype(jnp.float32), cf_exp], axis=2)
    return combined @ params["wf"] + params["bf"]


# ---------------------------------------------------------------------------
# Deterministic parameter init (PyTorch nn.Linear-style uniform bounds),
# stored as (in_features, out_features) so the kernel computes x @ W + b.
# ---------------------------------------------------------------------------
def init_params(key, feature_dim, hidden_dim):
    def linear(k, fan_in, fan_out):
        kw, kb = jax.random.split(k)
        bound = 1.0 / math.sqrt(fan_in)
        w = jax.random.uniform(kw, (fan_in, fan_out), jnp.float32, -bound, bound)
        b = jax.random.uniform(kb, (1, fan_out), jnp.float32, -bound, bound)
        return w, b

    k1, k2, k3, k4 = jax.random.split(key, 4)
    w1, b1 = linear(k1, 10, hidden_dim // 2)
    w2, b2 = linear(k2, hidden_dim // 2, hidden_dim)
    w3, b3 = linear(k3, hidden_dim, feature_dim)
    wf, bf = linear(k4, feature_dim * 2, feature_dim)
    return dict(w1=w1, b1=b1, w2=w2, b2=b2, w3=w3, b3=b3, wf=wf, bf=bf)


if __name__ == "__main__":
    B, K, F, H = 2, 4, 32, 64

    key = jax.random.PRNGKey(0)
    k_params, k_feat, k_kp = jax.random.split(key, 3)

    params = init_params(k_params, feature_dim=F, hidden_dim=H)
    keypoint_features = jax.random.normal(k_feat, (B, K, F), jnp.float32)
    keypoints = jax.random.uniform(k_kp, (B, K, 2), jnp.float32, 0.0, 1.0)

    ref = _reference_forward(params, keypoint_features, keypoints)

    # 1) f32-operand path: proves the algebraic fold is exact up to f32 rounding.
    out_f32 = quad_constraint_forward(params, keypoint_features, keypoints,
                                      compute_dtype=jnp.float32)
    out_f32 = jax.block_until_ready(out_f32)
    assert out_f32.shape == (B, K, F)
    err_f32 = float(jnp.max(jnp.abs(out_f32.astype(jnp.float32) - ref)))
    assert err_f32 < 1e-3, f"f32-path max abs err {err_f32}"

    # 2) Default fast path: bf16 MXU operands, f32 accumulation (precision
    #    tradeoff accepted per review -> looser accuracy budget).
    enhanced = quad_constraint_forward(params, keypoint_features, keypoints)
    enhanced = jax.block_until_ready(enhanced)
    assert enhanced.shape == (B, K, F)
    err_bf16 = float(jnp.max(jnp.abs(enhanced.astype(jnp.float32) - ref)))
    assert err_bf16 < 5e-2, f"bf16-path max abs err {err_bf16}"

    print("KERNEL_OK")
</pallas_src>

<mosaic_0001>
module attributes {stable_mosaic.version = 11 : i64} {
  func.func @_quad_constraint_kernel(%arg0: i32, %arg1: memref<2x10xf32, #tpu.memory_space<vmem>>, %arg2: memref<2x128xf32, #tpu.memory_space<vmem>>, %arg3: memref<10x32xf32, #tpu.memory_space<vmem>>, %arg4: memref<1x32xf32, #tpu.memory_space<vmem>>, %arg5: memref<32x64xf32, #tpu.memory_space<vmem>>, %arg6: memref<1x64xf32, #tpu.memory_space<vmem>>, %arg7: memref<64x128xf32, #tpu.memory_space<vmem>>, %arg8: memref<1x128xf32, #tpu.memory_space<vmem>>, %arg9: memref<128x128xf32, #tpu.memory_space<vmem>>, %arg10: memref<2x128xf32, #tpu.memory_space<vmem>>) attributes {dimension_semantics = [#tpu.dimension_semantics<parallel>], iteration_bounds = array<i64: 1>, scalar_prefetch = 0 : i64, scratch_operands = 0 : i64, tpu.core_type = #tpu.core_type<tc>, window_params = [{transform_indices = @transform_0, window_bounds = array<i64: 2, 10>}, {transform_indices = @transform_1, window_bounds = array<i64: 2, 128>}, {pipeline_mode = #tpu.pipeline_mode<synchronous>, transform_indices = @transform_2, window_bounds = array<i64: 10, 32>}, {pipeline_mode = #tpu.pipeline_mode<synchronous>, transform_indices = @transform_3, window_bounds = array<i64: 1, 32>}, {pipeline_mode = #tpu.pipeline_mode<synchronous>, transform_indices = @transform_4, window_bounds = array<i64: 32, 64>}, {pipeline_mode = #tpu.pipeline_mode<synchronous>, transform_indices = @transform_5, window_bounds = array<i64: 1, 64>}, {pipeline_mode = #tpu.pipeline_mode<synchronous>, transform_indices = @transform_6, window_bounds = array<i64: 64, 128>}, {pipeline_mode = #tpu.pipeline_mode<synchronous>, transform_indices = @transform_7, window_bounds = array<i64: 1, 128>}, {pipeline_mode = #tpu.pipeline_mode<synchronous>, transform_indices = @transform_8, window_bounds = array<i64: 128, 128>}, {transform_indices = @transform_9, window_bounds = array<i64: 2, 128>}]} {
    %c0 = arith.constant 0 : index
    %c0_0 = arith.constant 0 : index
    %0 = vector.load %arg1[%c0, %c0_0] : memref<2x10xf32, #tpu.memory_space<vmem>>, vector<2x10xf32>
    %c0_1 = arith.constant 0 : index
    %c0_2 = arith.constant 0 : index
    %1 = vector.load %arg3[%c0_1, %c0_2] : memref<10x32xf32, #tpu.memory_space<vmem>>, vector<10x32xf32>
    %cst = arith.constant dense<0.000000e+00> : vector<2x32xf32>
    %2 = tpu.matmul %0, %1, %cst {dimension_numbers = #tpu.dot_dimension_numbers<[1], [0], [0], [1], [0, 0, 1, 1], [], []>} : vector<2x10xf32>, vector<10x32xf32>, vector<2x32xf32> -> vector<2x32xf32>
    %c0_3 = arith.constant 0 : index
    %c0_4 = arith.constant 0 : index
    %3 = vector.load %arg4[%c0_3, %c0_4] : memref<1x32xf32, #tpu.memory_space<vmem>>, vector<1x32xf32>
    %4 = vector.broadcast %3 : vector<1x32xf32> to vector<2x32xf32>
    %5 = arith.addf %2, %4 : vector<2x32xf32>
    %cst_5 = arith.constant 0.000000e+00 : f32
    %6 = vector.broadcast %cst_5 : f32 to vector<2x32xf32>
    %7 = arith.maximumf %5, %6 : vector<2x32xf32>
    %c0_6 = arith.constant 0 : index
    %c0_7 = arith.constant 0 : index
    %8 = vector.load %arg5[%c0_6, %c0_7] : memref<32x64xf32, #tpu.memory_space<vmem>>, vector<32x64xf32>
    %cst_8 = arith.constant dense<0.000000e+00> : vector<2x64xf32>
    %9 = tpu.matmul %7, %8, %cst_8 {dimension_numbers = #tpu.dot_dimension_numbers<[1], [0], [0], [1], [0, 0, 1, 1], [], []>} : vector<2x32xf32>, vector<32x64xf32>, vector<2x64xf32> -> vector<2x64xf32>
    %c0_9 = arith.constant 0 : index
    %c0_10 = arith.constant 0 : index
    %10 = vector.load %arg6[%c0_9, %c0_10] : memref<1x64xf32, #tpu.memory_space<vmem>>, vector<1x64xf32>
    %11 = vector.broadcast %10 : vector<1x64xf32> to vector<2x64xf32>
    %12 = arith.addf %9, %11 : vector<2x64xf32>
    %cst_11 = arith.constant 0.000000e+00 : f32
    %13 = vector.broadcast %cst_11 : f32 to vector<2x64xf32>
    %14 = arith.maximumf %12, %13 : vector<2x64xf32>
    %c0_12 = arith.constant 0 : index
    %c0_13 = arith.constant 0 : index
    %15 = vector.load %arg7[%c0_12, %c0_13] : memref<64x128xf32, #tpu.memory_space<vmem>>, vector<64x128xf32>
    %cst_14 = arith.constant dense<0.000000e+00> : vector<2x128xf32>
    %16 = tpu.matmul %14, %15, %cst_14 {dimension_numbers = #tpu.dot_dimension_numbers<[1], [0], [0], [1], [0, 0, 1, 1], [], []>} : vector<2x64xf32>, vector<64x128xf32>, vector<2x128xf32> -> vector<2x128xf32>
    %c0_15 = arith.constant 0 : index
    %c0_16 = arith.constant 0 : index
    %17 = vector.load %arg8[%c0_15, %c0_16] : memref<1x128xf32, #tpu.memory_space<vmem>>, vector<1x128xf32>
    %18 = vector.broadcast %17 : vector<1x128xf32> to vector<2x128xf32>
    %19 = arith.addf %16, %18 : vector<2x128xf32>
    %c0_17 = arith.constant 0 : index
    %c0_18 = arith.constant 0 : index
    %20 = vector.load %arg2[%c0_17, %c0_18] : memref<2x128xf32, #tpu.memory_space<vmem>>, vector<2x128xf32>
    %c0_19 = arith.constant 0 : index
    %c0_20 = arith.constant 0 : index
    %21 = vector.load %arg9[%c0_19, %c0_20] : memref<128x128xf32, #tpu.memory_space<vmem>>, vector<128x128xf32>
    %cst_21 = arith.constant dense<0.000000e+00> : vector<2x128xf32>
    %22 = tpu.matmul %20, %21, %cst_21 {dimension_numbers = #tpu.dot_dimension_numbers<[1], [0], [0], [1], [0, 0, 1, 1], [], []>} : vector<2x128xf32>, vector<128x128xf32>, vector<2x128xf32> -> vector<2x128xf32>
    %23 = arith.addf %22, %19 : vector<2x128xf32>
    %c0_22 = arith.constant 0 : index
    %c0_23 = arith.constant 0 : index
    %24 = vector.load %arg10[%c0_22, %c0_23] : memref<2x128xf32, #tpu.memory_space<vmem>>, vector<2x128xf32>
    tpu.vector_store %arg10[%c0_22, %c0_23], %23 {strides = array<i32>} : memref<2x128xf32, #tpu.memory_space<vmem>>, vector<2x128xf32>,
    return
  }
  func.func @transform_0(%arg0: i32) -> (i32, i32) {
    %c0_i32 = arith.constant 0 : i32
    %c0_i32_0 = arith.constant 0 : i32
    return %arg0, %c0_i32 : i32, i32
  }
  func.func @transform_1(%arg0: i32) -> (i32, i32) {
    %c0_i32 = arith.constant 0 : i32
    %c0_i32_0 = arith.constant 0 : i32
    return %arg0, %c0_i32 : i32, i32
  }
  func.func @transform_2(%arg0: i32) -> (i32, i32) {
    %c0_i32 = arith.constant 0 : i32
    %c0_i32_0 = arith.constant 0 : i32
    %c0_i32_1 = arith.constant 0 : i32
    return %c0_i32, %c0_i32_0 : i32, i32
  }
  func.func @transform_3(%arg0: i32) -> (i32, i32) {
    %c0_i32 = arith.constant 0 : i32
    %c0_i32_0 = arith.constant 0 : i32
    %c0_i32_1 = arith.constant 0 : i32
    return %c0_i32, %c0_i32_0 : i32, i32
  }
  func.func @transform_4(%arg0: i32) -> (i32, i32) {
    %c0_i32 = arith.constant 0 : i32
    %c0_i32_0 = arith.constant 0 : i32
    %c0_i32_1 = arith.constant 0 : i32
    return %c0_i32, %c0_i32_0 : i32, i32
  }
  func.func @transform_5(%arg0: i32) -> (i32, i32) {
    %c0_i32 = arith.constant 0 : i32
    %c0_i32_0 = arith.constant 0 : i32
    %c0_i32_1 = arith.constant 0 : i32
    return %c0_i32, %c0_i32_0 : i32, i32
  }
  func.func @transform_6(%arg0: i32) -> (i32, i32) {
    %c0_i32 = arith.constant 0 : i32
    %c0_i32_0 = arith.constant 0 : i32
    %c0_i32_1 = arith.constant 0 : i32
    return %c0_i32, %c0_i32_0 : i32, i32
  }
  func.func @transform_7(%arg0: i32) -> (i32, i32) {
    %c0_i32 = arith.constant 0 : i32
    %c0_i32_0 = arith.constant 0 : i32
    %c0_i32_1 = arith.constant 0 : i32
    return %c0_i32, %c0_i32_0 : i32, i32
  }
  func.func @transform_8(%arg0: i32) -> (i32, i32) {
    %c0_i32 = arith.constant 0 : i32
    %c0_i32_0 = arith.constant 0 : i32
    %c0_i32_1 = arith.constant 0 : i32
    return %c0_i32, %c0_i32_0 : i32, i32
  }
  func.func @transform_9(%arg0: i32) -> (i32, i32) {
    %c0_i32 = arith.constant 0 : i32
    %c0_i32_0 = arith.constant 0 : i32
    return %arg0, %c0_i32 : i32, i32
  }
}

</mosaic_0001>

<bundles_post_ra>
// kernel: tpu_custom_call.1
= control target key start
LH: loop header
LB: loop body
LE: loop exit
PB: predicated region body
PF: predicated region fallthrough
CT: control target
= control target key end

     0   :  { %14 = vsyncpa [#allocation3], 0  ;;  %s569_s0 = inlined_call_operand.hbm [shape: f32[2,10], index: 0, kind: input, shape index: {}]   ;;  %s570_s1 = inlined_call_operand.hbm [shape: f32[2,128], index: 1, kind: input, shape index: {}]   ;;  %s571_s2 = inlined_call_operand.hbm [shape: f32[10,32], index: 2, kind: input, shape index: {}]   ;;  %s572_s3 = inlined_call_operand.vmem [shape: f32[1,32], index: 3, kind: input, shape index: {}]   ;;  %s573_s4 = inlined_call_operand.hbm [shape: f32[32,64], index: 4, kind: input, shape index: {}]   ;;  %s574_s5 = inlined_call_operand.vmem [shape: f32[1,64], index: 5, kind: input, shape index: {}]   ;;  %s575_s6 = inlined_call_operand.hbm [shape: f32[64,128], index: 6, kind: input, shape index: {}]   ;;  %s576_s7 = inlined_call_operand.vmem [shape: f32[1,128], index: 7, kind: input, shape index: {}]   ;;  %s577_s8 = inlined_call_operand.hbm [shape: f32[128,128], index: 8, kind: input, shape index: {}]   ;;  %s578_s9 = inlined_call_operand.hbm [shape: f32[2,128], index: 9, kind: output, shape index: {}]  }
   0x1   :  { %15 = vsyncpa [#allocation6], 0 }
   0x2   :  { %16 = vsyncpa [#allocation9], 0 }
   0x3   :  { %17 = vsyncpa [#allocation12], 0  ;;  %s35_s11 = sshll.u32 %s570_s1, 4  ;;  %s36_s11 = int_to_ptr.hbm [resolvable:$true] %s35_s11 }
   0x4   :  { %18 = vsyncpa [#allocation4], 0  ;;  %s480_s12 = smov [#allocation5]   ;;  %s60_s16 = sshll.u32 %s573_s4, 4  ;;  %s61_s16 = int_to_ptr.hbm [resolvable:$true] %s60_s16 }
   0x5   :  { %s37_s13 = sshll.u32 %s480_s12, 4  ;;  %s481_s17 = smov [#allocation8]   ;;  %s38_s13 = int_to_ptr.vmem [resolvable:$true] %s37_s13 }
   0x6   :  { %40 = dma.hbm_to_vmem [thread:$0]  %s36_s11, 32, %s38_s13, [#allocation6]  }
   0x7   :  { %s62_s18 = sshll.u32 %s481_s17, 4  ;;  %s24_s21 = sshll.u32 %s569_s0, 4  ;;  %s63_s18 = int_to_ptr.vmem [resolvable:$true] %s62_s18  ;;  %s25_s21 = int_to_ptr.hbm [resolvable:$true] %s24_s21 }
   0x8   :  { %s482_s1 = smov 128   ;;  %s483_s22 = smov 8  }
   0x9   :  { %68 = dma.hbm_to_vmem [thread:$0]  %s61_s16, 512, %s63_s18, [#allocation9], %s482_s1, %s482_s1, %s483_s22  }
   0xa   :  { %s45_s25 = sshll.u32 %s571_s2, 4  ;;  %s484_s26 = smov [#allocation2]   ;;  %s46_s25 = int_to_ptr.hbm [resolvable:$true] %s45_s25 }
   0xb   :  { %s26_s27 = sshll.u32 %s484_s26, 4  ;;  %s485_s4 = smov [#allocation7]   ;;  %s27_s27 = int_to_ptr.vmem [resolvable:$true] %s26_s27 }
   0xc   :  { %29 = dma.hbm_to_vmem [thread:$0]  %s25_s21, 32, %s27_s27, [#allocation3]  }
   0xd   :  { %s47_s28 = sshll.u32 %s485_s4, 4  ;;  %s75_s0 = sshll.u32 %s575_s6, 4  ;;  %s48_s28 = int_to_ptr.vmem [resolvable:$true] %s47_s28  ;;  %s76_s0 = int_to_ptr.hbm [resolvable:$true] %s75_s0 }
   0xe   :  { %53 = dma.hbm_to_vmem [thread:$0]  %s46_s25, 256, %s48_s28, [#allocation6], %s482_s1, %s482_s1, %s483_s22  }
   0xf   :  { %s90_s12 = sshll.u32 %s577_s8, 4  ;;  %s486_s13 = smov [#allocation10]   ;;  %s91_s12 = int_to_ptr.hbm [resolvable:$true] %s90_s12 }
  0x10   :  { %s77_s2 = sshll.u32 %s486_s13, 4  ;;  %s487_s14 = smov [#allocation11]   ;;  %s78_s2 = int_to_ptr.vmem [resolvable:$true] %s77_s2 }
  0x11   :  { %83 = dma.hbm_to_vmem [thread:$0]  %s76_s0, 1024, %s78_s2, [#allocation9], %s482_s1, %s482_s1, %s483_s22  }
  0x12   :  { %s92_s15 = sshll.u32 %s487_s14, 4  ;;  %s93_s15 = int_to_ptr.vmem [resolvable:$true] %s92_s15 }
  0x13   :  { %98 = dma.hbm_to_vmem [thread:$0]  %s91_s12, 2048, %s93_s15, [#allocation12], %s482_s1, %s482_s1, %s483_s22  }
  0x14   :  { %470 = dma.done.wait [#allocation3], 32  }
  0x15   :  { %471 = vsyncadd [#allocation3], 4294967264 }
  0x16   :  { %472 = dma.done.wait [#allocation6], 288  }
  0x17   :  { %473 = vsyncadd [#allocation6], 4294967008 }
  0x18   :  { %474 = dma.done.wait [#allocation9], 1536  }
  0x19   :  { %475 = vsyncadd [#allocation9], 4294965760 }
  0x1a   :  { %476 = dma.done.wait [#allocation12], 2048  }
  0x1b   :  { %477 = vsyncadd [#allocation12], 4294965248  ;;  %vm134_vm0 = vcmask 1041408   ;;  %v125_v0 = vld [vmem:[#allocation7 + $0x8] sm:$0x3]  ;;  %v124_v1 = vld [vmem:[#allocation7] sm:$0xff] }
  0x1c   :  { %286 = vmatpush.msk.msra.mxu0 %vm134_vm0, %v125_v0  ;;  %v123_v2 = vld [vmem:[#allocation2] sm:$0x3]  ;;  %vm130_vm1 = vcmask 80896   ;;  %v162_v3 = vld [vmem:[#allocation8 + $0x18] sm:$0xff]  ;;  %v161_v4 = vld [vmem:[#allocation8 + $0x10] sm:$0xff]  ;;  %vm167_vm2 = vcmask 261120  }
  0x1d   :  { %183 = vmatpush.msra.mxu1 %v162_v3  ;;  %v160_v5 = vld [vmem:[#allocation8 + $0x8] sm:$0xff]  ;;  %v159_v6 = vld [vmem:[#allocation8] sm:$0xff]  ;;  %v244_v7 = vld [vmem:[#allocation11 + $0x78] sm:$0xff]  ;;  %vm204_vm3 = vcmask 523264   ;;  %s488_s19 = smov [#allocation13]   ;;  %s273_s22 = sshll.u32 %s578_s9, 4  ;;  %s274_s22 = int_to_ptr.hbm [resolvable:$true] %s273_s22 }
  0x1e   :  { %153 = vmatpush.msra.mxu0 %v124_v1  ;;  %v243_v8 = vld [vmem:[#allocation11 + $0x70] sm:$0xff]  ;;  %245 = vmatpush.msra.mxu3 %v244_v7  ;;  %v242_v9 = vld [vmem:[#allocation11 + $0x68] sm:$0xff]  ;;  %v199_v10 = vld [vmem:[#allocation10 + $0x38] sm:$0xff]  ;;  %s271_s20 = sshll.u32 %s488_s19, 4  ;;  %s272_s20 = int_to_ptr.vmem [resolvable:$true] %s271_s20 }
  0x1f   :  { %287 = vmatmul.msk.f32.vlgmr.msra.gmra.mxu0 %vm130_vm1, %v123_v2  ;;  %184 = vmatpush.msra.mxu1 %v161_v4  ;;  %v198_v11 = vld [vmem:[#allocation10 + $0x30] sm:$0xff]  ;;  %v241_v12 = vld [vmem:[#allocation11 + $0x60] sm:$0xff]  ;;  %v197_v13 = vld [vmem:[#allocation10 + $0x28] sm:$0xff] }
  0x20   :  { %246 = vmatpush.msra.mxu3 %v243_v8  ;;  %216 = vmatpush.msra.mxu2 %v199_v10  ;;  %v240_v14 = vld [vmem:[#allocation11 + $0x58] sm:$0xff]  ;;  %v196_v15 = vld [vmem:[#allocation10 + $0x20] sm:$0xff]  ;;  %v239_v16 = vld [vmem:[#allocation11 + $0x50] sm:$0xff] }
  0x21   :  { %185 = vmatpush.msra.mxu1 %v160_v5  ;;  %v195_v17 = vld [vmem:[#allocation10 + $0x18] sm:$0xff]  ;;  %v238_v18 = vld [vmem:[#allocation11 + $0x48] sm:$0xff]  ;;  %v237_v19 = vld [vmem:[#allocation11 + $0x40] sm:$0xff] }
  0x22   :  { %247 = vmatpush.msra.mxu3 %v242_v9  ;;  %217 = vmatpush.msra.mxu2 %v198_v11  ;;  %v236_v20 = vld [vmem:[#allocation11 + $0x38] sm:$0xff]  ;;  %v235_v21 = vld [vmem:[#allocation11 + $0x30] sm:$0xff]  ;;  %v234_v22 = vld [vmem:[#allocation11 + $0x28] sm:$0xff] }
  0x23   :  { %186 = vmatpush.msra.mxu1 %v159_v6  ;;  %v233_v23 = vld [vmem:[#allocation11 + $0x20] sm:$0xff]  ;;  %v299_v24 = vld [vmem:[%s572_s3] ss:$0 sm:$0xff]  ;;  %v194_v28 = vld [vmem:[#allocation10 + $0x10] sm:$0xff] }
  0x24   :  { %248 = vmatpush.msra.mxu3 %v241_v12  ;;  %218 = vmatpush.msra.mxu2 %v197_v13  ;;  %v232_v29 = vld [vmem:[#allocation11 + $0x18] sm:$0xff]  ;;  %v193_v30 = vld [vmem:[#allocation10 + $0x8] sm:$0xff]  ;;  %v231_v31 = vld [vmem:[#allocation11 + $0x10] sm:$0xff] }
  0x25   :  { %v192_v32 = vld [vmem:[#allocation10] sm:$0xff]  ;;  %v230_v33 = vld [vmem:[#allocation11 + $0x8] sm:$0xff] }
  0x26   :  { %249 = vmatpush.msra.mxu3 %v240_v14  ;;  %219 = vmatpush.msra.mxu2 %v196_v15  ;;  %v229_v34 = vld [vmem:[#allocation11] sm:$0xff]  ;;  %v228_v35 = vld [vmem:[#allocation5] sm:$0x3]  ;;  %v300_v36 = vld [vmem:[%s574_s5] ss:$0 sm:$0xff] }
  0x27   :  { %v301_v40 = vld [vmem:[%s576_s7] ss:$0 sm:$0xff] }
  0x28   :  { %250 = vmatpush.msra.mxu3 %v239_v16  ;;  %220 = vmatpush.msra.mxu2 %v195_v17 }
  0x2a   :  { %251 = vmatpush.msra.mxu3 %v238_v18  ;;  %221 = vmatpush.msra.mxu2 %v194_v28 }
  0x2c   :  { %252 = vmatpush.msra.mxu3 %v237_v19  ;;  %222 = vmatpush.msra.mxu2 %v193_v30 }
  0x2e   :  { %253 = vmatpush.msra.mxu3 %v236_v20  ;;  %223 = vmatpush.msra.mxu2 %v192_v32 }
  0x30   :  { %254 = vmatpush.msra.mxu3 %v235_v21 }
  0x32   :  { %255 = vmatpush.msra.mxu3 %v234_v22 }
  0x34   :  { %256 = vmatpush.msra.mxu3 %v233_v23 }
  0x36   :  { %257 = vmatpush.msra.mxu3 %v232_v29 }
  0x38   :  { %258 = vmatpush.msra.mxu3 %v231_v31 }
  0x3a   :  { %259 = vmatpush.msra.mxu3 %v230_v33 }
  0x3c   :  { %260 = vmatpush.msra.mxu3 %v229_v34 }
  0x3d   :  { %261 = vmatmul.f32.vlgmr.msra.gmra.mxu3 %v228_v35 }
  0x9c   :  { %v155_v25 = vpop.f32.mrf.mxu0 }
  0x9d   :  { %v156_v26 = vadd.f32 %v299_v24, %v155_v25 }
  0x9f   :  { %v158_v27 = vmax.f32 %v156_v26, 0.0 }
  0xa1   :  { %288 = vmatmul.msk.f32.vlgmr.msra.gmra.mxu1 %vm167_vm2, %v158_v27 }
  0xc0   :  { %v262_v42 = vpop.f32.mrf.mxu3 }
 0x11e   :  { %v188_v37 = vpop.f32.mrf.mxu1 }
 0x11f   :  { %v189_v38 = vadd.f32 %v300_v36, %v188_v37 }
 0x121   :  { %v191_v39 = vmax.f32 %v189_v38, 0.0 }
 0x123   :  { %289 = vmatmul.msk.f32.vlgmr.msra.gmra.mxu2 %vm204_vm3, %v191_v39 }
 0x1a6   :  { %v225_v41 = vpop.f32.mrf.mxu2 }
 0x1a7   :  { %v226_v43 = vadd.f32 %v301_v40, %v225_v41 }
 0x1a9   :  { %v263_v44 = vadd.f32 %v262_v42, %v226_v43 }
 0x1ab   :  { %265 = vst [vmem:[#allocation13] sm:$0x3] %v263_v44 }
 0x1ac   :  { %276 = dma.vmem_to_hbm [thread:$0]  %s272_s20, 32, %s274_s22, [#allocation4]  }
 0x1ad   :  { %478 = dma.done.wait [#allocation4], 32  }
 0x1ae   :  { %479 = vsyncadd [#allocation4], 4294967264 }
 0x1af   :  { %281 = vsyncpa [#allocation3], 1 }
 0x1b0   :  { %282 = vsyncpa [#allocation6], 1 }
 0x1b1   :  { %283 = vsyncpa [#allocation9], 1 }
 0x1b2   :  { %284 = vsyncpa [#allocation12], 1 }
 0x1b3   :  { %285 = vsyncpa [#allocation4], 1 }

</bundles_post_ra>
